<compile_context>
chip_gen: v5e
topology: v5e:2x2
jax: 0.10.0
libtpu: 0.0.40
codegen_flags: <defaults>
</compile_context>

<pallas_src>
import functools

import jax
import jax.numpy as jnp
from jax.experimental import pallas as pl
from jax.experimental.pallas import tpu as pltpu


# -----------------------------------------------------------------------------
# Pallas kernel: one fused matmul -> [pre-activation | res_connect], epilogue
# -----------------------------------------------------------------------------
def _suc_kernel(lq_ref, uc_ref, w_ref, b_ref, out_ref, *,
                tqm, gw, d_model, win_start, win_rows, col_blocks):
    # lq_ref  : (tqm, gw)           residual input, phase+group merged layout
    # uc_ref  : (Mpg, g*d_model)    whole halo-padded compressed input, grouped
    # w_ref   : (n_off*d_model, 2*gw)  fused weight [sparseTConv | res_connect]
    # b_ref   : (1, gw)             bias tiled across phases (f32)
    # out_ref : (tqm, gw)
    i = pl.program_id(1)
    start = pl.multiple_of(i * tqm + win_start, 8)

    # Union halo window covering every compressed row this tile touches,
    # loaded once; per-offset slabs are static slices of it.
    win = uc_ref[pl.ds(start, win_rows), :]
    slabs = [win[ro:ro + tqm, cs:cs + d_model] for ro, cs in col_blocks]
    stage = slabs[0] if len(slabs) == 1 else jnp.concatenate(slabs, axis=1)

    # Single wide-K MXU matmul: left half = sparseTConv pre-activation,
    # right half = res_connect (scaled-identity columns of the weight).
    fused = jnp.dot(stage, w_ref[...], preferred_element_type=jnp.float32)

    act = jnp.maximum(fused[:, :gw] + b_ref[...], 0.0)
    # TODO(synk): nn.Dropout is treated as identity (eval mode / p == 0).
    out = lq_ref[...].astype(jnp.float32) + act + fused[:, gw:]
    out_ref[...] = out.astype(out_ref.dtype)


# -----------------------------------------------------------------------------
# Wrapper
# -----------------------------------------------------------------------------
def sparse_uncompress_convolution(layer_query, uncompress_in, weight, bias, *,
                                  filter_size, stride, upper_pad,
                                  tq=None, compute_dtype=None):
    B, H, N, D = layer_query.shape
    M = uncompress_in.shape[2]
    pad = filter_size - upper_pad - 1
    assert pad >= 0, "negative ConstantPad1d (cropping) is not supported"
    assert filter_size >= 1 and stride >= 1
    if compute_dtype is None:
        compute_dtype = uncompress_in.dtype

    # --- enumerate nonzero taps of the kron-upsampled convolution -----------
    # output row n uses tap f iff (n + f - pad) % stride == 0, reading
    # compressed row (n + f - pad)//stride (zero row if out of range).
    taps = []
    for p in range(stride):
        for f in range(filter_size):
            if (p + f - pad) % stride == 0:
                taps.append((p, f, (p + f - pad) // stride))
    assert taps, "degenerate configuration: no active taps"
    offsets = sorted({d for _, _, d in taps})
    d_min = offsets[0]

    # --- lane-density grouping: merge g consecutive phase-merged rows into
    #     the lane dim so the output block last dim is a multiple of 128 ------
    sd = stride * D
    if sd % 128 == 0:
        g = 1
    else:
        g = next((c for c in range(2, 9) if (c * sd) % 128 == 0), 0)
        if g == 0:
            g = max(1, min(8, -(-128 // sd)))      # at least 128 output lanes
    gw = g * sd                    # output lanes per super-row
    grp = g * stride               # output rows merged into one super-row

    offs_g = sorted({j + d for j in range(g) for d in offsets})
    n_off = len(offs_g)
    k_of = {o: k for k, o in enumerate(offs_g)}
    K = n_off * D

    BH = B * H
    R = -(-N // grp)               # real super-rows

    # Halo-left zero rows; padded so every tile's window load starts 8-aligned.
    lpad = max(0, -d_min)
    lpad += (-(lpad + d_min)) % (8 * g)
    a_vals = [lpad + o for o in offs_g]
    t_lo, t_hi = a_vals[0] // g, a_vals[-1] // g
    col_blocks = tuple((a // g - t_lo, (a % g) * D) for a in a_vals)

    # --- tile sizing: big HBM-roofline sized blocks, bounded by VMEM ---------
    item_lq = jnp.dtype(layer_query.dtype).itemsize
    item_c = jnp.dtype(compute_dtype).itemsize
    try:
        vmem_cap = int(getattr(pltpu.get_tpu_info(), "vmem_capacity_bytes",
                               64 << 20))
    except Exception:
        vmem_cap = 64 << 20        # conservative (v7x-safe) fallback
    vmem_budget = max(32 << 20, min(vmem_cap * 3 // 4, 100 << 20))

    def _win_rows(tqm_):
        return -(-(tqm_ + (t_hi - t_lo)) // 8) * 8

    def _mpg(tqm_):
        num_tiles_ = -(-R // tqm_)
        return max(-(-(lpad + M) // g),
                   (num_tiles_ - 1) * tqm_ + t_lo + _win_rows(tqm_))

    def _vmem_need(tqm_):
        blocks = 4 * tqm_ * gw * item_lq                 # lq + out, 2 bufs each
        ucg_b = 2 * _mpg(tqm_) * g * D * item_c          # whole (b,h) slab
        wts = 2 * K * 2 * gw * item_c + 2 * gw * 4       # fused weight + bias
        temps = (tqm_ * K * item_c + _win_rows(tqm_) * g * D * item_c
                 + 4 * tqm_ * 2 * gw * 4)                # stage/window/epilogue
        return blocks + ucg_b + wts + temps + (2 << 20)

    if tq is not None:
        tqm = max(8, (max(1, tq // g) // 8) * 8)
    else:                                   # target ~2 MiB lq/out blocks
        tqm = max(8, ((2 << 20) // max(1, gw * max(item_lq, 4)) // 8) * 8)
    tqm = min(tqm, -(-R // 8) * 8)
    while tqm > 8 and _vmem_need(tqm) > vmem_budget:
        tqm = max(8, ((tqm // 2) // 8) * 8)

    num_tiles = -(-R // tqm)
    Rp = num_tiles * tqm
    Nw = Rp * grp
    win_rows = _win_rows(tqm)
    Mpg = max(-(-(lpad + M) // g), (num_tiles - 1) * tqm + t_lo + win_rows)
    Mp = Mpg * g
    rpad = Mp - lpad - M

    # --- phase + group merged views (metadata-only reshapes) -----------------
    lq = layer_query
    if Nw != N:
        lq = jnp.pad(lq, ((0, 0), (0, 0), (0, Nw - N), (0, 0)))
    lq2 = lq.reshape(BH, Rp, gw)

    uc2 = uncompress_in.reshape(BH, M, D).astype(compute_dtype)
    uc2 = jnp.pad(uc2, ((0, 0), (lpad, rpad), (0, 0)))
    ucg = uc2.reshape(BH, Mpg, g * D)

    # --- fused weight: [sparseTConv blocks | (1/F)*I res_connect blocks] -----
    w_t = weight.T.astype(jnp.float32)                       # (F*D, D)
    eye = jnp.eye(D, dtype=jnp.float32) * (1.0 / filter_size)
    w_full = jnp.zeros((K, 2 * gw), dtype=jnp.float32)
    for j in range(g):
        for (p, f, d) in taps:
            r = k_of[j + d] * D
            c = (j * stride + p) * D
            w_full = w_full.at[r:r + D, c:c + D].add(w_t[f * D:(f + 1) * D, :])
            w_full = w_full.at[r:r + D, gw + c:gw + c + D].add(eye)
    w_full = w_full.astype(compute_dtype)
    bias_t = jnp.tile(bias.astype(jnp.float32).reshape(1, D), (1, g * stride))

    kernel = functools.partial(
        _suc_kernel, tqm=tqm, gw=gw, d_model=D, win_start=t_lo,
        win_rows=win_rows, col_blocks=col_blocks)

    out2 = pl.pallas_call(
        kernel,
        out_shape=jax.ShapeDtypeStruct((BH, Rp, gw), layer_query.dtype),
        grid_spec=pltpu.PrefetchScalarGridSpec(
            num_scalar_prefetch=0,
            grid=(BH, num_tiles),
            in_specs=[
                pl.BlockSpec((None, tqm, gw), lambda bh, i: (bh, i, 0)),
                # TODO(synk): for very long sequences on v7x (64 MiB VMEM) the
                # whole-(b,h)-resident slab should become a per-tile haloed
                # window via manual make_async_copy to keep VMEM O(tile).
                pl.BlockSpec((None, Mpg, g * D), lambda bh, i: (bh, 0, 0)),
                pl.BlockSpec((K, 2 * gw), lambda bh, i: (0, 0)),
                pl.BlockSpec((1, gw), lambda bh, i: (0, 0)),
            ],
            out_specs=pl.BlockSpec((None, tqm, gw), lambda bh, i: (bh, i, 0)),
        ),
        compiler_params=pltpu.CompilerParams(
            dimension_semantics=("parallel", "arbitrary"),
            vmem_limit_bytes=int(vmem_budget)),
    )(lq2, ucg, w_full, bias_t)

    return out2.reshape(B, H, Nw, D)[:, :, :N, :]


# -----------------------------------------------------------------------------
# Pure-JAX reference (mirrors the PyTorch forward exactly, dropout = identity)
# -----------------------------------------------------------------------------
def reference(layer_query, uncompress_in, weight, bias, *,
              filter_size, stride, upper_pad):
    B, H, N, D = layer_query.shape
    M = uncompress_in.shape[2]
    kron = jnp.zeros((stride,), layer_query.dtype).at[0].set(1.0)
    ts = jnp.einsum('ijac,b->ijcab', uncompress_in, kron)
    ts = ts.reshape(B, H, D, M * stride)
    pad = filter_size - upper_pad - 1
    ts = jnp.pad(ts, ((0, 0), (0, 0), (0, 0), (pad, pad)))
    L = ts.shape[-1] - filter_size + 1
    idx = jnp.arange(L)[:, None] + jnp.arange(filter_size)[None, :]
    up = ts[..., idx]                              # (B,H,D,L,F)
    up = up[:, :, :, :N, :]
    up = jnp.transpose(up, (0, 1, 3, 4, 2))        # (B,H,N,F,D)
    res_connect = up.sum(3) / filter_size
    up_flat = up.reshape(B, H, N, filter_size * D)
    out = up_flat @ weight.T + bias
    out = jax.nn.relu(out)
    return layer_query + out + res_connect


def _assert_close(a, b, tol, name):
    err = float(jnp.max(jnp.abs(a.astype(jnp.float32) - b.astype(jnp.float32))))
    assert err < tol, f"{name}: max abs err {err:.4e} >= {tol}"


def _run_case(key, B, H, N, D, M, filter_size, stride, upper_pad):
    k1, k2, k3, k4 = jax.random.split(key, 4)
    layer_query = jax.random.normal(k1, (B, H, N, D), dtype=jnp.float32)
    uncompress_in = jax.random.normal(k2, (B, H, M, D), dtype=jnp.float32)
    fan_in = D * filter_size
    bound = 1.0 / (fan_in ** 0.5)
    weight = jax.random.uniform(k3, (D, fan_in), minval=-bound, maxval=bound,
                                dtype=jnp.float32)
    bias = jax.random.uniform(k4, (D,), minval=-bound, maxval=bound,
                              dtype=jnp.float32)

    ref = reference(layer_query, uncompress_in, weight, bias,
                    filter_size=filter_size, stride=stride, upper_pad=upper_pad)

    out = sparse_uncompress_convolution(
        layer_query, uncompress_in, weight, bias,
        filter_size=filter_size, stride=stride, upper_pad=upper_pad)
    out = jax.block_until_ready(out)
    assert out.shape == (B, H, N, D)
    _assert_close(out, ref, 3e-2, f"f32 case {(B, H, N, D, filter_size, stride)}")

    out_bf16 = sparse_uncompress_convolution(
        layer_query, uncompress_in, weight, bias,
        filter_size=filter_size, stride=stride, upper_pad=upper_pad,
        compute_dtype=jnp.bfloat16)
    out_bf16 = jax.block_until_ready(out_bf16)
    _assert_close(out_bf16, ref, 1.5e-1,
                  f"bf16 case {(B, H, N, D, filter_size, stride)}")


if __name__ == "__main__":
    key = jax.random.PRNGKey(0)
    k_a, k_b = jax.random.split(key)

    # Module-consistent small shapes: (batch, heads, seq, d_model)
    _run_case(k_a, B=2, H=4, N=16, D=32, M=8,
              filter_size=3, stride=2, upper_pad=1)

    # Ragged / negative-offset config (exercises halo padding + grouping g=8).
    _run_case(k_b, B=1, H=2, N=19, D=16, M=7,
              filter_size=5, stride=3, upper_pad=0)

    print("KERNEL_OK")
</pallas_src>

<mosaic_0001>
module attributes {stable_mosaic.version = 11 : i64} {
  func.func @_suc_kernel(%arg0: i32, %arg1: i32, %arg2: memref<1x8x128xf32, #tpu.memory_space<vmem>>, %arg3: memref<1x16x64xf32, #tpu.memory_space<vmem>>, %arg4: memref<96x256xf32, #tpu.memory_space<vmem>>, %arg5: memref<1x128xf32, #tpu.memory_space<vmem>>, %arg6: memref<1x8x128xf32, #tpu.memory_space<vmem>>) attributes {dimension_semantics = [#tpu.dimension_semantics<parallel>, #tpu.dimension_semantics<arbitrary>], iteration_bounds = array<i64: 8, 1>, scalar_prefetch = 0 : i64, scratch_operands = 0 : i64, tpu.core_type = #tpu.core_type<tc>, window_params = [{transform_indices = @transform_0, window_bounds = array<i64: 1, 8, 128>}, {transform_indices = @transform_1, window_bounds = array<i64: 1, 16, 64>}, {pipeline_mode = #tpu.pipeline_mode<synchronous>, transform_indices = @transform_2, window_bounds = array<i64: 96, 256>}, {pipeline_mode = #tpu.pipeline_mode<synchronous>, transform_indices = @transform_3, window_bounds = array<i64: 1, 128>}, {transform_indices = @transform_4, window_bounds = array<i64: 1, 8, 128>}]} {
    %c8_i32 = arith.constant 8 : i32
    %0 = arith.muli %arg1, %c8_i32 : i32
    %c0_i32 = arith.constant 0 : i32
    %1 = arith.addi %0, %c0_i32 : i32
    %2 = tpu.assume_multiple %1, 8 : i32
    %c0 = arith.constant 0 : index
    %3 = arith.index_cast %2 : i32 to index
    %c0_0 = arith.constant 0 : index
    %4 = vector.load %arg3[%c0, %3, %c0_0] : memref<1x16x64xf32, #tpu.memory_space<vmem>>, vector<1x16x64xf32>
    %5 = vector.shape_cast %4 : vector<1x16x64xf32> to vector<16x64xf32>
    %6 = vector.extract_strided_slice %5 {offsets = [0, 0], sizes = [8, 32], strides = [1, 1]} : vector<16x64xf32> to vector<8x32xf32>
    %7 = vector.extract_strided_slice %5 {offsets = [0, 32], sizes = [8, 32], strides = [1, 1]} : vector<16x64xf32> to vector<8x32xf32>
    %8 = vector.extract_strided_slice %5 {offsets = [1, 0], sizes = [8, 32], strides = [1, 1]} : vector<16x64xf32> to vector<8x32xf32>
    %9 = tpu.concatenate %6, %7, %8 in 1 : vector<8x32xf32>, vector<8x32xf32>, vector<8x32xf32> -> vector<8x96xf32>
    %c0_1 = arith.constant 0 : index
    %c0_2 = arith.constant 0 : index
    %10 = vector.load %arg4[%c0_1, %c0_2] : memref<96x256xf32, #tpu.memory_space<vmem>>, vector<96x256xf32>
    %cst = arith.constant dense<0.000000e+00> : vector<8x256xf32>
    %11 = tpu.matmul %9, %10, %cst {dimension_numbers = #tpu.dot_dimension_numbers<[1], [0], [0], [1], [0, 0, 1, 1], [], []>} : vector<8x96xf32>, vector<96x256xf32>, vector<8x256xf32> -> vector<8x256xf32>
    %12 = vector.extract_strided_slice %11 {offsets = [0, 0], sizes = [8, 128], strides = [1, 1]} : vector<8x256xf32> to vector<8x128xf32>
    %c0_3 = arith.constant 0 : index
    %c0_4 = arith.constant 0 : index
    %13 = vector.load %arg5[%c0_3, %c0_4] : memref<1x128xf32, #tpu.memory_space<vmem>>, vector<1x128xf32>
    %14 = vector.broadcast %13 : vector<1x128xf32> to vector<8x128xf32>
    %15 = arith.addf %12, %14 : vector<8x128xf32>
    %cst_5 = arith.constant 0.000000e+00 : f32
    %16 = vector.broadcast %cst_5 : f32 to vector<8x128xf32>
    %17 = arith.maximumf %15, %16 : vector<8x128xf32>
    %c0_6 = arith.constant 0 : index
    %c0_7 = arith.constant 0 : index
    %c0_8 = arith.constant 0 : index
    %18 = vector.load %arg2[%c0_6, %c0_7, %c0_8] : memref<1x8x128xf32, #tpu.memory_space<vmem>>, vector<1x8x128xf32>
    %19 = vector.shape_cast %18 : vector<1x8x128xf32> to vector<8x128xf32>
    %20 = arith.addf %19, %17 : vector<8x128xf32>
    %21 = vector.extract_strided_slice %11 {offsets = [0, 128], sizes = [8, 128], strides = [1, 1]} : vector<8x256xf32> to vector<8x128xf32>
    %22 = arith.addf %20, %21 : vector<8x128xf32>
    %c0_9 = arith.constant 0 : index
    %c0_10 = arith.constant 0 : index
    %c0_11 = arith.constant 0 : index
    %23 = vector.load %arg6[%c0_9, %c0_10, %c0_11] : memref<1x8x128xf32, #tpu.memory_space<vmem>>, vector<1x8x128xf32>
    %24 = vector.shape_cast %23 : vector<1x8x128xf32> to vector<8x128xf32>
    %25 = vector.shape_cast %22 : vector<8x128xf32> to vector<1x8x128xf32>
    tpu.vector_store %arg6[%c0_9, %c0_10, %c0_11], %25 {strides = array<i32>} : memref<1x8x128xf32, #tpu.memory_space<vmem>>, vector<1x8x128xf32>,
    return
  }
  func.func @transform_0(%arg0: i32, %arg1: i32) -> (i32, i32, i32) {
    %c0_i32 = arith.constant 0 : i32
    %c0_i32_0 = arith.constant 0 : i32
    return %arg0, %arg1, %c0_i32 : i32, i32, i32
  }
  func.func @transform_1(%arg0: i32, %arg1: i32) -> (i32, i32, i32) {
    %c0_i32 = arith.constant 0 : i32
    %c0_i32_0 = arith.constant 0 : i32
    %c0_i32_1 = arith.constant 0 : i32
    return %arg0, %c0_i32, %c0_i32_0 : i32, i32, i32
  }
  func.func @transform_2(%arg0: i32, %arg1: i32) -> (i32, i32) {
    %c0_i32 = arith.constant 0 : i32
    %c0_i32_0 = arith.constant 0 : i32
    %c0_i32_1 = arith.constant 0 : i32
    return %c0_i32, %c0_i32_0 : i32, i32
  }
  func.func @transform_3(%arg0: i32, %arg1: i32) -> (i32, i32) {
    %c0_i32 = arith.constant 0 : i32
    %c0_i32_0 = arith.constant 0 : i32
    %c0_i32_1 = arith.constant 0 : i32
    return %c0_i32, %c0_i32_0 : i32, i32
  }
  func.func @transform_4(%arg0: i32, %arg1: i32) -> (i32, i32, i32) {
    %c0_i32 = arith.constant 0 : i32
    %c0_i32_0 = arith.constant 0 : i32
    return %arg0, %arg1, %c0_i32 : i32, i32, i32
  }
}

</mosaic_0001>

<bundles_post_ra>
// kernel: tpu_custom_call.1
= control target key start
LH: loop header
LB: loop body
LE: loop exit
PB: predicated region body
PF: predicated region fallthrough
CT: control target
= control target key end

     0   :  { %s1003_s0 = inlined_call_operand.hbm [shape: f32[8,8,128], index: 0, kind: input, shape index: {}]   ;;  %s1004_s1 = inlined_call_operand.hbm [shape: f32[8,16,64], index: 1, kind: input, shape index: {}]   ;;  %s1005_s2 = inlined_call_operand.hbm [shape: f32[96,256], index: 2, kind: input, shape index: {}]   ;;  %s1006_s3 = inlined_call_operand.vmem [shape: f32[1,128], index: 3, kind: input, shape index: {}]   ;;  %s1007_s4 = inlined_call_operand.hbm [shape: f32[8,8,128], index: 4, kind: output, shape index: {}]  }
   0x1   :  { %1009 = sst [smem:[#allocation15_spill]] %s1003_s0 }
   0x2   :  { %1010 = sst [smem:[#allocation16_spill]] %s1005_s2 }
   0x3   :  { %9 = vsyncpa [#allocation3], 0 }
   0x4   :  { %11 = vsyncpa [#allocation3 + $0x1], 0 }
   0x5   :  { %12 = vsyncpa [#allocation6], 0 }
   0x6   :  { %14 = vsyncpa [#allocation6 + $0x1], 0 }
   0x7   :  { %15 = vsyncpa [#allocation4], 0 }
   0x8   :  { %17 = vsyncpa [#allocation4 + $0x1], 0  ;;  %s833_s15 = smov 0   ;;  %s835_s16 = smov 0  }
   0x9   :  { %s837_s17 = smov 0   ;;  %s839_s18 = smov 0  }
   0xa   :  { %s841_s19 = smov 0   ;;  %s843_s20 = smov 0  }
   0xb LB: > { %s864_s21 = sadd.s32 4294967295, %s800_s20   ;;  %p516_p0 = scmp.ge.s32.totalorder %s800_s20, 1  ;;  %s800_s20 = sphi %s843_s20, %s23_s20   ;;  %s796_s19 = sphi %s841_s19, %s1027_s19   ;;  %s792_s18 = sphi %s839_s18, %s1026_s18   ;;  %s788_s17 = sphi %s837_s17, %s1025_s17   ;;  %s784_s16 = sphi %s835_s16, %s1024_s16   ;;  %s780_s15 = sphi %s833_s15, %s1023_s15  }
   0xc   : > { %p58_p1 = scmp.eq.s32.totalorder %s864_s21, 0  ;;  %p164_p2 = scmp.lt.s32.totalorder %s800_s20, 9 }
   0xd   : > { %s1011_s2 = sld [smem:[#allocation16_spill]]  ;;  %s802_s26 = smov [#allocation7]  }
   0xe   : > { %p872_p3 = pnand %p516_p0, %p164_p2  ;;  %s177_s27 = sshll.u32 %s802_s26, 4  ;;  %s178_s27 = int_to_ptr.vmem [resolvable:$true] %s177_s27 }
   0xf   : > { %s803_s28 = smov 256   ;;  %s804_s29 = smov 16  }
  0x10   : > { %p546_p4 = pneg %p872_p3  ;;  %s515_s30 = sadd.s32 4294967294, %s800_s20  }
  0x11   : > { %s35_s5 = sadd.s32 1, %s796_s19  ;;  %s44_s6 = sadd.s32 1, %s788_s17 }
  0x12   : > { %p547_p5 = pnand %p546_p4, %p58_p1  ;;  %p37_p6 = scmp.ge.s32.totalorder %s35_s5, 8 }
  0x13   : > { %s175_s24 = sshll.u32 %s1011_s2, 4  ;;  %p51_p7 = scmp.ne.s32.totalorder %s788_s17, %s784_s16  ;;  %s176_s24 = int_to_ptr.hbm [resolvable:$true] %s175_s24 }
  0x14   : > { %549 = dma.hbm_to_vmem [thread:$0]  (!%p547_p5), %s176_s24, 3072, %s178_s27, [#allocation6], %s803_s28, %s803_s28, %s804_s29  }
  0x15   : > { %p52_p8 = scmp.eq.s32.totalorder %s800_s20, 0  ;;  %p57_p9 = scmp.ne.s32.totalorder %s784_s16, %s780_s15 }
  0x16   : > { %s1029_s5 = smov (%p37_p6, %s35_s5), 0  ;;  %p151_p12 = scmp.eq.s32.totalorder %s864_s21, 7 }
  0x17   : > { %1013 = sst [smem:[#allocation13_spill]] %s1029_s5  ;;  %p890_p10 = por %p52_p8, %p51_p7 }
  0x18   : > { %p896_p11 = por %p58_p1, %p57_p9  ;;  %s39_s9 = ssub.s32 %s796_s19, %s1029_s5 }
  0x19   : > { %p42_p13 = scmp.eq.s32.totalorder %s39_s9, 0  ;;  %p157_p0 = scmp.eq.s32.totalorder %s515_s30, 7 }
  0x1a   : > { %p903_p2 = por %p151_p12, %p51_p7  ;;  %p562_p4 = scmp.lt.s32.totalorder %s800_s20, 8 }
  0x1b   : > { %s909_s11 = scalar_select %p42_p13, %s788_s17, %s44_s6  }
  0x1c   : > { %p911_p5 = por %p157_p0, %p57_p9  ;;  %s194_s13 = sand.u32 1, %s788_s17  }
  0x1d   : > { %1017 = sst [smem:[#allocation14_spill]] %s909_s11  ;;  %s519_s14 = sshll.u32 %s194_s13, 3 }
  0x1e   : > { %s520_s22 = sshll.u32 %s796_s19, 3  ;;  %s1019_s0 = sld [smem:[#allocation15_spill]] }
  0x1f   : > { %s198_s27 = scalar_lea.vmem [#allocation2], %s519_s14  ;;  %p922_p6 = pnand %p562_p4, %p890_p10 }
  0x20   : > { %s207_s28 = sshll.u32 %s198_s27, 4  ;;  %s521_s6 = sshll.u32 %s194_s13, 4  ;;  %s208_s28 = int_to_ptr.vmem [resolvable:$true] %s207_s28 }
  0x21   : > { %s535_s9 = sshll.u32 %s796_s19, 4  ;;  %s195_s2 = scalar_lea.sflag [#allocation3], %s194_s13 }
  0x22   : > { %s218_s5 = scalar_lea.vmem [#allocation5], %s521_s6  ;;  %s806_s11 = smov 8  }
  0x23   : > { %s226_s23 = sshll.u32 %s218_s5, 4  ;;  %s227_s23 = int_to_ptr.vmem [resolvable:$true] %s226_s23 }
  0x24   : > { %s203_s26 = scalar_lea.hbm %s1019_s0, %s520_s22  ;;  %s214_s22 = sand.u32 1, %s800_s20  }
  0x25   : > { %s205_s29 = sshll.u32 %s203_s26, 4  ;;  %s223_s26 = scalar_lea.hbm %s1004_s1, %s535_s9  ;;  %s206_s29 = int_to_ptr.hbm [resolvable:$true] %s205_s29 }
  0x26   : > { %553 = dma.hbm_to_vmem [thread:$0]  (!%p922_p6), %s206_s29, 128, %s208_s28, %s195_s2  }
  0x27   : > { %s224_s7 = sshll.u32 %s223_s26, 4  ;;  %s215_s27 = scalar_lea.sflag [#allocation6], %s214_s22  ;;  %s225_s7 = int_to_ptr.hbm [resolvable:$true] %s224_s7 }
  0x28   : > { %s805_s0 = smov 128   ;;  %238 = sbr.rel (%p872_p3) target bundleno = 308 (0x134), region = 36 }
  0x29   : > { %556 = dma.hbm_to_vmem [thread:$0]  (!%p922_p6), %s225_s7, 256, %s227_s23, %s215_s27, %s805_s0, %s805_s0, %s806_s11  }
  0x2a   : > { %s938_s2 = sand.u32 (!%p872_p3), 1, %s784_s16  }
  0x2b   : > { %s525_s5 = sshll.u32 (!%p872_p3), %s938_s2, 3  ;;  %s241_s13 = scalar_lea.sflag (!%p872_p3), [#allocation3], %s938_s2 }
  0x2c   : > { %s944_s28 = scalar_lea.vmem (!%p872_p3), [#allocation2], %s525_s5 }
  0x2d   : > { %763 = dma.done.wait (%p896_p11), %s241_s13, 128  }
  0x2e   : > { %765 = vsyncadd (%p896_p11), %s241_s13, 4294967168  ;;  %s250_s0 = sand.u32 1, %s864_s21   ;;  %s526_s25 = sshll.u32 %s938_s2, 4 }
  0x2f   : > { %s251_s11 = scalar_lea.sflag [#allocation6], %s250_s0  ;;  %s254_s29 = scalar_lea.vmem [#allocation5], %s526_s25 }
  0x30   : > { %767 = dma.done.wait (%p896_p11), %s251_s11, 256  }
  0x31   : > { %769 = vsyncadd (%p896_p11), %s251_s11, 4294967040 }
  0x32   : > { %771 = dma.done.wait (%p58_p1), [#allocation6], 3072  }
  0x33   : > { %773 = vsyncadd (%p58_p1), [#allocation6], 4294964224  ;;  %v292_v0 = vld [vmem:[%s254_s29] sm:$0xff]  ;;  %v293_v1 = vld [vmem:[%s254_s29 + $0x8] sm:$0xff]  ;;  %vm296_vm0 = vcmask 1046528   ;;  %s807_s8 = smov 64  }
  0x34   : > { %v327_v2 = vld [vmem:[#allocation7 + $0xb0] sm:$0xff]  ;;  %v297_v3 = vrot.slane %v292_v0, 1  ;;  %v298_v4 = vrot.slane %v293_v1, 1  ;;  %v328_v5 = vld [vmem:[#allocation7 + $0xb8] sm:$0xff]  ;;  %v325_v6 = vld [vmem:[#allocation7 + $0xa0] sm:$0xff]  ;;  %vm303_vm1 = vcmask 523264  }
  0x35   : > { %337 = vmatpush.msra.mxu0 %v327_v2  ;;  %v326_v7 = vld [vmem:[#allocation7 + $0xa8] sm:$0xff]  ;;  %357 = vmatpush.msra.mxu1 %v328_v5  ;;  %v323_v8 = vld [vmem:[#allocation7 + $0x90] sm:$0xff]  ;;  %v324_v10 = vld [vmem:[#allocation7 + $0x98] sm:$0xff]  ;;  %vm329_vm2 = vcmask 785408   ;;  %s532_s6 = sshll.u32 %s792_s18, 3  ;;  %s289_s14 = scalar_lea.vmem [#allocation8], %s525_s5 }
  0x36   : > { %v299_v9 = vsel %vm296_vm0, %v297_v3, %v298_v4  ;;  %v321_v11 = vld [vmem:[#allocation7 + $0x80] sm:$0xff]  ;;  %v322_v12 = vld [vmem:[#allocation7 + $0x88] sm:$0xff]  ;;  %v319_v13 = vld [vmem:[#allocation7 + $0x70] sm:$0xff]  ;;  %s395_s22 = scalar_lea.hbm %s1007_s4, %s532_s6  ;;  %s397_s24 = sshll.u32 %s289_s14, 4  ;;  %s398_s24 = int_to_ptr.vmem [resolvable:$true] %s397_s24 }
  0x37   : > { %338 = vmatpush.msra.mxu0 %v325_v6  ;;  %300 = vrot.lane.b32.xlu0 %v299_v9, %s807_s8  ;;  %v320_v14 = vld [vmem:[#allocation7 + $0x78] sm:$0xff]  ;;  %v317_v15 = vld [vmem:[#allocation7 + $0x60] sm:$0xff]  ;;  %v318_v16 = vld [vmem:[#allocation7 + $0x68] sm:$0xff]  ;;  %s399_s26 = sshll.u32 %s395_s22, 4  ;;  %s384_s18 = scalar_lea.sflag [#allocation4], %s938_s2  ;;  %s400_s26 = int_to_ptr.hbm [resolvable:$true] %s399_s26 }
  0x38   : > { %358 = vmatpush.msra.mxu1 %v326_v7  ;;  %v315_v17 = vld [vmem:[#allocation7 + $0x50] sm:$0xff]  ;;  %v316_v18 = vld [vmem:[#allocation7 + $0x58] sm:$0xff]  ;;  %v313_v19 = vld [vmem:[#allocation7 + $0x40] sm:$0xff]  ;;  %s724_s7 = sshra.s32 %s400_s26, 4  ;;  %s730_s5 = scalar_lea.hbm %s1007_s4, 64  ;;  %s725_s7 = int_to_ptr.hbm [resolvable:$true] %s724_s7 }
  0x39   : > { %339 = vmatpush.msra.mxu0 %v323_v8  ;;  %v314_v20 = vld [vmem:[#allocation7 + $0x48] sm:$0xff]  ;;  %v311_v21 = vld [vmem:[#allocation7 + $0x30] sm:$0xff]  ;;  %v312_v22 = vld [vmem:[#allocation7 + $0x38] sm:$0xff]  ;;  %s726_s27 = scalar_lea.hbm %s725_s7, 8  ;;  %p731_p8 = scmp.lt.s32.totalorder %s725_s7, %s1007_s4 }
  0x3a   : > { %359 = vmatpush.msra.mxu1 %v324_v10  ;;  %v309_v23 = vld [vmem:[#allocation7 + $0x20] sm:$0xff]  ;;  %v310_v24 = vld [vmem:[#allocation7 + $0x28] sm:$0xff]  ;;  %v307_v25 = vld [vmem:[#allocation7 + $0x10] sm:$0xff]  ;;  %p727_p1 = scmp.ne.s32.totalorder %s725_s7, %s726_s27  ;;  %p732_p9 = scmp.lt.s32.totalorder %s730_s5, %s726_s27 }
  0x3b   : > { %340 = vmatpush.msra.mxu0 %v321_v11  ;;  %v308_v26 = vld [vmem:[#allocation7 + $0x18] sm:$0xff]  ;;  %v305_v27 = vld [vmem:[#allocation7] sm:$0xff]  ;;  %v306_v28 = vld [vmem:[#allocation7 + $0x8] sm:$0xff] }
  0x3c   : > { %360 = vmatpush.msra.mxu1 %v322_v12  ;;  %v619_v31 = vld [vmem:[%s1006_s3] ss:$0 sm:$0xff]  ;;  %p728_p3 = pnand %p727_p1, %p903_p2  ;;  %p733_p10 = por %p732_p9, %p731_p8 }
  0x3d   : > { %341 = vmatpush.msra.mxu0 %v319_v13  ;;  %v379_v34 = vld [vmem:[%s944_s28] sm:$0xff] }
  0x3e   : > { %361 = vmatpush.msra.mxu1 %v320_v14  ;;  %p729_p7 = pneg %p728_p3 }
  0x3f   : > { %342 = vmatpush.msra.mxu0 %v317_v15 }
  0x40   : > { %362 = vmatpush.msra.mxu1 %v318_v16  ;;  %p734_p11 = pnand %p733_p10, %p729_p7 }
  0x41   : > { %343 = vmatpush.msra.mxu0 %v315_v17 }
  0x42   : > { %363 = vmatpush.msra.mxu1 %v316_v18 }
  0x43   : > { %344 = vmatpush.msra.mxu0 %v313_v19 }
  0x44   : > { %364 = vmatpush.msra.mxu1 %v314_v20 }
  0x45   : > { %345 = vmatpush.msra.mxu0 %v311_v21 }
  0x46   : > { %365 = vmatpush.msra.mxu1 %v312_v22 }
  0x47   : > { %346 = vmatpush.msra.mxu0 %v309_v23 }
  0x48   : > { %366 = vmatpush.msra.mxu1 %v310_v24 }
  0x49   : > { %347 = vmatpush.msra.mxu0 %v307_v25 }
  0x4a   : > { %367 = vmatpush.msra.mxu1 %v308_v26 }
  0x4b   : > { %348 = vmatpush.msra.mxu0 %v305_v27 }
  0x4c   : > { %368 = vmatpush.msra.mxu1 %v306_v28 }
  0xa9   : > { %v301_v29 = vpop.permute.xlu0 %300 }
  0xaa   : > { %v304_v30 = vsel %vm303_vm1, %v292_v0, %v301_v29 }
  0xab   : > { %529 = vmatmul.msk.f32.vlgmr.msra.gmra.mxu0 %vm329_vm2, %v304_v30  ;;  %530 = vmatmul.msk.f32.vlgmr.msra.gmra.mxu1 %vm329_vm2, %v304_v30 }
 0x128   : > { %v350_v32 = vpop.f32.mrf.mxu0  ;;  %v370_v37 = vpop.f32.mrf.mxu1 }
 0x129   : > { %v377_v33 = vadd.f32 %v619_v31, %v350_v32 }
 0x12b   : > { %v378_v35 = vmax.f32 %v377_v33, 0.0 }
 0x12d   : > { %v380_v36 = vadd.f32 %v379_v34, %v378_v35 }
 0x12f   : > { %v381_v38 = vadd.f32 %v380_v36, %v370_v37 }
 0x131   : > { %382 = vst [vmem:[%s289_s14] sm:$0xff] %v381_v38 }
 0x132   : > { %737 = shalt.err (!%p734_p11)
}
 0x133   : > { %544 = dma.vmem_to_hbm [thread:$0]  (%p903_p2), %s398_s24, 128, %s400_s26, %s384_s18  }
 0x134 PF: > { %p564_p12 = scmp.ge.s32.totalorder %s800_s20, 2  ;;  %s411_s2 = sand.u32 1, %s780_s15  }
 0x135   : > { %s412_s11 = scalar_lea.sflag [#allocation4], %s411_s2 }
 0x136   : > { %p558_p13 = pnand %p564_p12, %p911_p5 }
 0x138   : > { %p559_p0 = pneg %p558_p13 }
 0x13a   : > { %775 = dma.done.wait (%p559_p0), %s412_s11, 128  }
 0x13b   : > { %777 = vsyncadd (%p559_p0), %s412_s11, 4294967168  ;;  %s23_s20 = sadd.s32 1, %s800_s20   ;;  %s1021_s29 = sld [smem:[#allocation14_spill]] }
 0x13c   : > { %p20_p4 = scmp.ge.s32.totalorder %s23_s20, 10   ;;  %s1022_s10 = sld [smem:[#allocation13_spill]] }
 0x13d   : > { %s1023_s15 = smov %s784_s16  ;;  %s1024_s16 = smov %s788_s17 }
 0x13e   : > { %s1026_s18 = smov %s796_s19  ;;  %22 = sbr.rel (!%p20_p4) target bundleno = 11 (0xb), region = 99 }
 0x141   : > { %s1025_s17 = smov %s1021_s29 }
 0x142   : > { %s1027_s19 = smov %s1022_s10 }
 0x143   :  { %418 = vsyncpa [#allocation3], 1 }
 0x144   :  { %420 = vsyncpa [#allocation3 + $0x1], 1 }
 0x145   :  { %421 = vsyncpa [#allocation6], 1 }
 0x146   :  { %423 = vsyncpa [#allocation6 + $0x1], 1 }
 0x147   :  { %424 = vsyncpa [#allocation4], 1 }
 0x148   :  { %426 = vsyncpa [#allocation4 + $0x1], 1 }

</bundles_post_ra>
